<compile_context>
chip_gen: v5e
topology: v5e:2x2
jax: 0.10.0
libtpu: 0.0.40
codegen_flags: <defaults>
</compile_context>

<pallas_src>
import functools

import jax
import jax.numpy as jnp
from jax.experimental import pallas as pl
from jax.experimental.pallas import tpu as pltpu


def _mha_kernel(x_ref, wqkv_ref, bqkv_ref, wot_ref, bo_ref, *rest,
                num_heads, head_dim, seq_len, need_weights):
    if need_weights:
        o_ref, aw_ref, o_scr = rest
    else:
        (o_ref, o_scr), aw_ref = rest, None

    H, Dh, S = num_heads, head_dim, seq_len
    E = H * Dh
    Bb = x_ref.shape[0] // S

    # ---- one fused QKV projection for the whole batch block ('nt': contract minor dims) ----
    # The 1/sqrt(Dh) scale is pre-folded into the Q rows of both the weight and the bias.
    qkv_t = jax.lax.dot_general(
        wqkv_ref[...], x_ref[...], (((1,), (1,)), ((), ())),
        preferred_element_type=jnp.float32) + bqkv_ref[...]            # (3E, Bb*S)

    inv_h = 1.0 / H
    for bb in range(Bb):                      # static unroll (tiny trip count at these shapes)
        c0 = bb * S
        qkv_b = qkv_t[:, c0:c0 + S]           # (3E, S): one static lane slice per batch row
        if need_weights:
            aw = jnp.zeros((S, S), jnp.float32)
        for h in range(H):                    # static unroll over heads
            r = h * Dh                        # sublane-aligned row offsets (Dh multiple of 8)
            qh_t = qkv_b[r:r + Dh, :]                     # (Dh, S)  (Q pre-scaled)
            kh_t = qkv_b[E + r:E + r + Dh, :]             # (Dh, S)
            vh_t = qkv_b[2 * E + r:2 * E + r + Dh, :]     # (Dh, S)

            # scores = (scaled q_h) @ k_h^T: contract the sublane (Dh) dims -> no transpose.
            s = jax.lax.dot_general(qh_t, kh_t, (((0,), (0,)), ((), ())),
                                    preferred_element_type=jnp.float32)   # (Sq, Sk)
            s = s - jnp.max(s, axis=-1, keepdims=True)
            e = jnp.exp(s)
            den = jnp.sum(e, axis=-1, keepdims=True)
            inv = pl.reciprocal(den, approx=True)          # EUP seed (free slot)
            inv = inv * (2.0 - den * inv)                  # one Newton step -> ~f32-exact
            p = e * inv                                    # softmax over keys

            # o_h^T = v_h^T @ p^T ('nt': contract the key dim) -> (Dh, Sq)
            oht = jax.lax.dot_general(vh_t, p, (((1,), (1,)), ((), ())),
                                      preferred_element_type=jnp.float32)
            o_scr[r:r + Dh, c0:c0 + S] = oht               # heads stack on sublanes
            if need_weights:
                aw = aw + p
        if need_weights:
            aw_ref[c0:c0 + S, :] = aw * inv_h              # head-averaged weights, slab row block

    # ---- single output projection for the whole block: contract the sublane (E) dims ----
    out = jax.lax.dot_general(o_scr[...], wot_ref[...], (((0,), (0,)), ((), ())),
                              preferred_element_type=jnp.float32)       # (Bb*S, E)
    o_ref[...] = out + bo_ref[...]


def _tensorcores_per_chip():
    # v4 / v5p / v7x expose 2 TensorCores per chip; v5e / v6e have 1.
    try:
        kind = jax.devices()[0].device_kind.lower()
    except Exception:
        return 2            # conservative default: keep >= 2 grid steps
    return 2 if any(tag in kind for tag in ("v7", "v5p", "v4")) else 1


def _vmem_budget_bytes():
    cap = 64 << 20          # v7x has the smallest per-TC VMEM (64 MiB)
    try:
        cap = int(getattr(pltpu.get_tpu_info(), "vmem_capacity_bytes", cap)) or cap
    except Exception:
        pass
    return cap // 2         # headroom for double-buffering + compiler temporaries


def feature_attention(x, in_proj_w, in_proj_b, out_proj_w, out_proj_b, num_heads,
                      need_weights=True, batch_block=None):
    B, S, E = x.shape
    if E % num_heads:
        raise ValueError("embed_dim must be divisible by num_heads")
    Dh = E // num_heads
    scale = 1.0 / (Dh ** 0.5)

    # ---- one-time wrapper-side preprocessing (plain XLA ops, outside the kernel) ----
    q_scale = jnp.concatenate([jnp.full((E,), scale, jnp.float32),
                               jnp.ones((2 * E,), jnp.float32)])
    w_qkv = in_proj_w.astype(jnp.float32) * q_scale[:, None]              # (3E, E), Q rows pre-scaled
    b_qkv = (in_proj_b.astype(jnp.float32) * q_scale).reshape(3 * E, 1)   # (3E, 1), fused bias
    w_o_t = out_proj_w.astype(jnp.float32).T                              # (E_in, E_out), pre-transposed
    b_o = out_proj_b.astype(jnp.float32).reshape(1, E)                    # (1, E)
    x2d = x.astype(jnp.float32).reshape(B * S, E)                         # tokens on sublanes

    # ---- generation-aware batch block selection with a VMEM guard ----
    def vmem_bytes(bb):
        toks = bb * S
        io = 2 * 4 * toks * (E + E + (S if need_weights else 0))   # double-buffered x / o / aw blocks
        wts = 2 * 4 * (3 * E * E + 3 * E + E * E + E)               # weights + biases
        scr = 4 * E * toks                                          # o_scr scratch
        tmp = 4 * toks * (3 * E + E) + 4 * 4 * S * S                # qkv_t, projection, per-head temps
        return io + wts + scr + tmp

    budget = _vmem_budget_bytes()
    if batch_block is not None:
        if B % batch_block:
            raise ValueError(f"batch_block={batch_block} must divide batch size {B}")
        Bb = batch_block
    else:
        multi_tc = _tensorcores_per_chip() >= 2
        Bb = 1
        for cand in range(B, 0, -1):
            if B % cand:
                continue
            if multi_tc and B >= 2 and B // cand < 2:
                continue          # keep >= 2 "parallel" steps so both TensorCores get work
            if vmem_bytes(cand) > budget:
                continue
            Bb = cand
            break
    grid = (B // Bb,)

    kernel = functools.partial(_mha_kernel, num_heads=num_heads, head_dim=Dh,
                               seq_len=S, need_weights=need_weights)

    def const_spec(shape):
        n = len(shape)
        # Constant index map -> grid-invariant operand (no re-DMA after the first step).
        return pl.BlockSpec(shape, lambda b: (0,) * n)

    in_specs = [
        pl.BlockSpec((Bb * S, E), lambda b: (b, 0)),   # tokens of this batch block
        const_spec((3 * E, E)),                        # fused, pre-scaled QKV weight
        const_spec((3 * E, 1)),                        # fused, pre-scaled QKV bias
        const_spec((E, E)),                            # pre-transposed output projection
        const_spec((1, E)),                            # output bias
    ]
    out_shape = [jax.ShapeDtypeStruct((B * S, E), jnp.float32)]
    out_specs = [pl.BlockSpec((Bb * S, E), lambda b: (b, 0))]
    if need_weights:
        out_shape.append(jax.ShapeDtypeStruct((B * S, S), jnp.float32))
        out_specs.append(pl.BlockSpec((Bb * S, S), lambda b: (b, 0)))

    outs = pl.pallas_call(
        kernel,
        out_shape=tuple(out_shape),
        grid=grid,
        in_specs=in_specs,
        out_specs=tuple(out_specs),
        scratch_shapes=[pltpu.VMEM((E, Bb * S), jnp.float32)],
        compiler_params=pltpu.CompilerParams(
            dimension_semantics=("parallel",),
            vmem_limit_bytes=32 * 1024 * 1024,     # explicit; tiny usage here, headroom for growth
        ),
    )(x2d, w_qkv, b_qkv, w_o_t, b_o)

    out = outs[0].reshape(B, S, E)
    if need_weights:
        return out, outs[1].reshape(B, S, S)
    return out, None


def reference(x, in_proj_w, in_proj_b, out_proj_w, out_proj_b, num_heads):
    """Pure-JAX reference matching torch.nn.MultiheadAttention forward (eval mode)."""
    B, S, E = x.shape
    Dh = E // num_heads
    qkv = jnp.einsum('bse,fe->bsf', x, in_proj_w) + in_proj_b
    q, k, v = jnp.split(qkv, 3, axis=-1)

    def heads(t):
        return t.reshape(B, S, num_heads, Dh).transpose(0, 2, 1, 3)

    q, k, v = heads(q) / (Dh ** 0.5), heads(k), heads(v)
    s = jnp.einsum('bhqd,bhkd->bhqk', q, k)
    p = jax.nn.softmax(s, axis=-1)
    o = jnp.einsum('bhqk,bhkd->bhqd', p, v).transpose(0, 2, 1, 3).reshape(B, S, E)
    o = jnp.einsum('bse,fe->bsf', o, out_proj_w) + out_proj_b
    return o, p.mean(axis=1)


if __name__ == "__main__":
    B, S, E, H = 2, 8, 32, 4     # batch, seq, embed_dim (input_dim), num_heads
    key = jax.random.PRNGKey(0)
    kx, k1, k2, k3, k4 = jax.random.split(key, 5)

    x = jax.random.normal(kx, (B, S, E), dtype=jnp.float32)
    # deterministic synthetic parameters (shapes per nn.MultiheadAttention)
    in_proj_w = jax.random.normal(k1, (3 * E, E), dtype=jnp.float32) * 0.1
    in_proj_b = jax.random.normal(k2, (3 * E,), dtype=jnp.float32) * 0.1
    out_proj_w = jax.random.normal(k3, (E, E), dtype=jnp.float32) * 0.1
    out_proj_b = jax.random.normal(k4, (E,), dtype=jnp.float32) * 0.1

    ref_out, ref_w = reference(x, in_proj_w, in_proj_b, out_proj_w, out_proj_b, H)

    # Exercise the auto (generation-aware) path plus both explicit blockings
    # (grid=(B,) with Bb=1 and grid=(1,) with Bb=B).
    for bb_opt in (None, 1, B):
        out, attn_w = feature_attention(x, in_proj_w, in_proj_b, out_proj_w, out_proj_b, H,
                                        batch_block=bb_opt)
        jax.block_until_ready((out, attn_w))
        assert out.shape == (B, S, E) and attn_w.shape == (B, S, S)
        assert jnp.allclose(out, ref_out, atol=1e-4, rtol=1e-4)
        assert jnp.allclose(attn_w, ref_w, atol=1e-4, rtol=1e-3)

    # need_weights=False fast path (weights output elided entirely)
    out_nw, none_w = feature_attention(x, in_proj_w, in_proj_b, out_proj_w, out_proj_b, H,
                                       need_weights=False)
    jax.block_until_ready(out_nw)
    assert none_w is None
    assert jnp.allclose(out_nw, ref_out, atol=1e-4, rtol=1e-4)

    print("KERNEL_OK")
</pallas_src>

<mosaic_0001>
module attributes {stable_mosaic.version = 11 : i64} {
  func.func @_mha_kernel(%arg0: i32, %arg1: memref<16x32xf32, #tpu.memory_space<vmem>>, %arg2: memref<96x32xf32, #tpu.memory_space<vmem>>, %arg3: memref<96x1xf32, #tpu.memory_space<vmem>>, %arg4: memref<32x32xf32, #tpu.memory_space<vmem>>, %arg5: memref<1x32xf32, #tpu.memory_space<vmem>>, %arg6: memref<16x32xf32, #tpu.memory_space<vmem>>, %arg7: memref<16x8xf32, #tpu.memory_space<vmem>>, %arg8: memref<32x16xf32, #tpu.memory_space<vmem>>) attributes {dimension_semantics = [#tpu.dimension_semantics<parallel>], iteration_bounds = array<i64: 1>, scalar_prefetch = 0 : i64, scratch_operands = 1 : i64, tpu.core_type = #tpu.core_type<tc>, window_params = [{transform_indices = @transform_0, window_bounds = array<i64: 16, 32>}, {pipeline_mode = #tpu.pipeline_mode<synchronous>, transform_indices = @transform_1, window_bounds = array<i64: 96, 32>}, {pipeline_mode = #tpu.pipeline_mode<synchronous>, transform_indices = @transform_2, window_bounds = array<i64: 96, 1>}, {pipeline_mode = #tpu.pipeline_mode<synchronous>, transform_indices = @transform_3, window_bounds = array<i64: 32, 32>}, {pipeline_mode = #tpu.pipeline_mode<synchronous>, transform_indices = @transform_4, window_bounds = array<i64: 1, 32>}, {transform_indices = @transform_5, window_bounds = array<i64: 16, 32>}, {transform_indices = @transform_6, window_bounds = array<i64: 16, 8>}]} {
    %c0 = arith.constant 0 : index
    %c0_0 = arith.constant 0 : index
    %0 = vector.load %arg2[%c0, %c0_0] : memref<96x32xf32, #tpu.memory_space<vmem>>, vector<96x32xf32>
    %c0_1 = arith.constant 0 : index
    %c0_2 = arith.constant 0 : index
    %1 = vector.load %arg1[%c0_1, %c0_2] : memref<16x32xf32, #tpu.memory_space<vmem>>, vector<16x32xf32>
    %cst = arith.constant dense<0.000000e+00> : vector<96x16xf32>
    %2 = tpu.matmul %0, %1, %cst {dimension_numbers = #tpu.dot_dimension_numbers<[1], [1], [0], [0], [0, 0, 1, 0], [], []>} : vector<96x32xf32>, vector<16x32xf32>, vector<96x16xf32> -> vector<96x16xf32>
    %c0_3 = arith.constant 0 : index
    %c0_4 = arith.constant 0 : index
    %3 = vector.load %arg3[%c0_3, %c0_4] : memref<96x1xf32, #tpu.memory_space<vmem>>, vector<96x1xf32>
    %4 = vector.broadcast %3 : vector<96x1xf32> to vector<96x16xf32>
    %5 = arith.addf %2, %4 : vector<96x16xf32>
    %6 = vector.extract_strided_slice %5 {offsets = [0, 0], sizes = [96, 8], strides = [1, 1]} : vector<96x16xf32> to vector<96x8xf32>
    %cst_5 = arith.constant 0.000000e+00 : f32
    %7 = vector.broadcast %cst_5 : f32 to vector<8x8xf32>
    %8 = vector.extract_strided_slice %6 {offsets = [0, 0], sizes = [8, 8], strides = [1, 1]} : vector<96x8xf32> to vector<8x8xf32>
    %9 = vector.extract_strided_slice %6 {offsets = [32, 0], sizes = [8, 8], strides = [1, 1]} : vector<96x8xf32> to vector<8x8xf32>
    %10 = vector.extract_strided_slice %6 {offsets = [64, 0], sizes = [8, 8], strides = [1, 1]} : vector<96x8xf32> to vector<8x8xf32>
    %cst_6 = arith.constant dense<0.000000e+00> : vector<8x8xf32>
    %11 = tpu.matmul %8, %9, %cst_6 {dimension_numbers = #tpu.dot_dimension_numbers<[0], [0], [1], [1], [0, 1, 1, 1], [], []>} : vector<8x8xf32>, vector<8x8xf32>, vector<8x8xf32> -> vector<8x8xf32>
    %cst_7 = arith.constant dense<0xFF800000> : vector<8xf32>
    %12 = vector.multi_reduction <maximumf>, %11, %cst_7 [1] : vector<8x8xf32> to vector<8xf32>
    %13 = vector.shape_cast %12 : vector<8xf32> to vector<8x1xf32>
    %14 = vector.broadcast %13 : vector<8x1xf32> to vector<8x8xf32>
    %15 = arith.subf %11, %14 : vector<8x8xf32>
    %16 = math.exp %15 : vector<8x8xf32>
    %cst_8 = arith.constant dense<0.000000e+00> : vector<8xf32>
    %17 = vector.multi_reduction <add>, %16, %cst_8 [1] : vector<8x8xf32> to vector<8xf32>
    %18 = vector.shape_cast %17 : vector<8xf32> to vector<8x1xf32>
    %19 = tpu.reciprocal %18 {approx = true} : vector<8x1xf32> -> vector<8x1xf32>
    %20 = arith.mulf %18, %19 : vector<8x1xf32>
    %cst_9 = arith.constant 2.000000e+00 : f32
    %21 = vector.broadcast %cst_9 : f32 to vector<8x1xf32>
    %22 = arith.subf %21, %20 : vector<8x1xf32>
    %23 = arith.mulf %19, %22 : vector<8x1xf32>
    %24 = vector.broadcast %23 : vector<8x1xf32> to vector<8x8xf32>
    %25 = arith.mulf %16, %24 : vector<8x8xf32>
    %cst_10 = arith.constant dense<0.000000e+00> : vector<8x8xf32>
    %26 = tpu.matmul %10, %25, %cst_10 {dimension_numbers = #tpu.dot_dimension_numbers<[1], [1], [0], [0], [0, 0, 1, 0], [], []>} : vector<8x8xf32>, vector<8x8xf32>, vector<8x8xf32> -> vector<8x8xf32>
    %c0_11 = arith.constant 0 : index
    %c0_12 = arith.constant 0 : index
    %27 = vector.load %arg8[%c0_11, %c0_12] : memref<32x16xf32, #tpu.memory_space<vmem>>, vector<8x8xf32>
    tpu.vector_store %arg8[%c0_11, %c0_12], %26 {strides = array<i32>} : memref<32x16xf32, #tpu.memory_space<vmem>>, vector<8x8xf32>,
    %28 = arith.addf %7, %25 : vector<8x8xf32>
    %29 = vector.extract_strided_slice %6 {offsets = [8, 0], sizes = [8, 8], strides = [1, 1]} : vector<96x8xf32> to vector<8x8xf32>
    %30 = vector.extract_strided_slice %6 {offsets = [40, 0], sizes = [8, 8], strides = [1, 1]} : vector<96x8xf32> to vector<8x8xf32>
    %31 = vector.extract_strided_slice %6 {offsets = [72, 0], sizes = [8, 8], strides = [1, 1]} : vector<96x8xf32> to vector<8x8xf32>
    %cst_13 = arith.constant dense<0.000000e+00> : vector<8x8xf32>
    %32 = tpu.matmul %29, %30, %cst_13 {dimension_numbers = #tpu.dot_dimension_numbers<[0], [0], [1], [1], [0, 1, 1, 1], [], []>} : vector<8x8xf32>, vector<8x8xf32>, vector<8x8xf32> -> vector<8x8xf32>
    %cst_14 = arith.constant dense<0xFF800000> : vector<8xf32>
    %33 = vector.multi_reduction <maximumf>, %32, %cst_14 [1] : vector<8x8xf32> to vector<8xf32>
    %34 = vector.shape_cast %33 : vector<8xf32> to vector<8x1xf32>
    %35 = vector.broadcast %34 : vector<8x1xf32> to vector<8x8xf32>
    %36 = arith.subf %32, %35 : vector<8x8xf32>
    %37 = math.exp %36 : vector<8x8xf32>
    %cst_15 = arith.constant dense<0.000000e+00> : vector<8xf32>
    %38 = vector.multi_reduction <add>, %37, %cst_15 [1] : vector<8x8xf32> to vector<8xf32>
    %39 = vector.shape_cast %38 : vector<8xf32> to vector<8x1xf32>
    %40 = tpu.reciprocal %39 {approx = true} : vector<8x1xf32> -> vector<8x1xf32>
    %41 = arith.mulf %39, %40 : vector<8x1xf32>
    %cst_16 = arith.constant 2.000000e+00 : f32
    %42 = vector.broadcast %cst_16 : f32 to vector<8x1xf32>
    %43 = arith.subf %42, %41 : vector<8x1xf32>
    %44 = arith.mulf %40, %43 : vector<8x1xf32>
    %45 = vector.broadcast %44 : vector<8x1xf32> to vector<8x8xf32>
    %46 = arith.mulf %37, %45 : vector<8x8xf32>
    %cst_17 = arith.constant dense<0.000000e+00> : vector<8x8xf32>
    %47 = tpu.matmul %31, %46, %cst_17 {dimension_numbers = #tpu.dot_dimension_numbers<[1], [1], [0], [0], [0, 0, 1, 0], [], []>} : vector<8x8xf32>, vector<8x8xf32>, vector<8x8xf32> -> vector<8x8xf32>
    %c8 = arith.constant 8 : index
    %c0_18 = arith.constant 0 : index
    %48 = vector.load %arg8[%c8, %c0_18] : memref<32x16xf32, #tpu.memory_space<vmem>>, vector<8x8xf32>
    tpu.vector_store %arg8[%c8, %c0_18], %47 {strides = array<i32>} : memref<32x16xf32, #tpu.memory_space<vmem>>, vector<8x8xf32>,
    %49 = arith.addf %28, %46 : vector<8x8xf32>
    %50 = vector.extract_strided_slice %6 {offsets = [16, 0], sizes = [8, 8], strides = [1, 1]} : vector<96x8xf32> to vector<8x8xf32>
    %51 = vector.extract_strided_slice %6 {offsets = [48, 0], sizes = [8, 8], strides = [1, 1]} : vector<96x8xf32> to vector<8x8xf32>
    %52 = vector.extract_strided_slice %6 {offsets = [80, 0], sizes = [8, 8], strides = [1, 1]} : vector<96x8xf32> to vector<8x8xf32>
    %cst_19 = arith.constant dense<0.000000e+00> : vector<8x8xf32>
    %53 = tpu.matmul %50, %51, %cst_19 {dimension_numbers = #tpu.dot_dimension_numbers<[0], [0], [1], [1], [0, 1, 1, 1], [], []>} : vector<8x8xf32>, vector<8x8xf32>, vector<8x8xf32> -> vector<8x8xf32>
    %cst_20 = arith.constant dense<0xFF800000> : vector<8xf32>
    %54 = vector.multi_reduction <maximumf>, %53, %cst_20 [1] : vector<8x8xf32> to vector<8xf32>
    %55 = vector.shape_cast %54 : vector<8xf32> to vector<8x1xf32>
    %56 = vector.broadcast %55 : vector<8x1xf32> to vector<8x8xf32>
    %57 = arith.subf %53, %56 : vector<8x8xf32>
    %58 = math.exp %57 : vector<8x8xf32>
    %cst_21 = arith.constant dense<0.000000e+00> : vector<8xf32>
    %59 = vector.multi_reduction <add>, %58, %cst_21 [1] : vector<8x8xf32> to vector<8xf32>
    %60 = vector.shape_cast %59 : vector<8xf32> to vector<8x1xf32>
    %61 = tpu.reciprocal %60 {approx = true} : vector<8x1xf32> -> vector<8x1xf32>
    %62 = arith.mulf %60, %61 : vector<8x1xf32>
    %cst_22 = arith.constant 2.000000e+00 : f32
    %63 = vector.broadcast %cst_22 : f32 to vector<8x1xf32>
    %64 = arith.subf %63, %62 : vector<8x1xf32>
    %65 = arith.mulf %61, %64 : vector<8x1xf32>
    %66 = vector.broadcast %65 : vector<8x1xf32> to vector<8x8xf32>
    %67 = arith.mulf %58, %66 : vector<8x8xf32>
    %cst_23 = arith.constant dense<0.000000e+00> : vector<8x8xf32>
    %68 = tpu.matmul %52, %67, %cst_23 {dimension_numbers = #tpu.dot_dimension_numbers<[1], [1], [0], [0], [0, 0, 1, 0], [], []>} : vector<8x8xf32>, vector<8x8xf32>, vector<8x8xf32> -> vector<8x8xf32>
    %c16 = arith.constant 16 : index
    %c0_24 = arith.constant 0 : index
    %69 = vector.load %arg8[%c16, %c0_24] : memref<32x16xf32, #tpu.memory_space<vmem>>, vector<8x8xf32>
    tpu.vector_store %arg8[%c16, %c0_24], %68 {strides = array<i32>} : memref<32x16xf32, #tpu.memory_space<vmem>>, vector<8x8xf32>,
    %70 = arith.addf %49, %67 : vector<8x8xf32>
    %71 = vector.extract_strided_slice %6 {offsets = [24, 0], sizes = [8, 8], strides = [1, 1]} : vector<96x8xf32> to vector<8x8xf32>
    %72 = vector.extract_strided_slice %6 {offsets = [56, 0], sizes = [8, 8], strides = [1, 1]} : vector<96x8xf32> to vector<8x8xf32>
    %73 = vector.extract_strided_slice %6 {offsets = [88, 0], sizes = [8, 8], strides = [1, 1]} : vector<96x8xf32> to vector<8x8xf32>
    %cst_25 = arith.constant dense<0.000000e+00> : vector<8x8xf32>
    %74 = tpu.matmul %71, %72, %cst_25 {dimension_numbers = #tpu.dot_dimension_numbers<[0], [0], [1], [1], [0, 1, 1, 1], [], []>} : vector<8x8xf32>, vector<8x8xf32>, vector<8x8xf32> -> vector<8x8xf32>
    %cst_26 = arith.constant dense<0xFF800000> : vector<8xf32>
    %75 = vector.multi_reduction <maximumf>, %74, %cst_26 [1] : vector<8x8xf32> to vector<8xf32>
    %76 = vector.shape_cast %75 : vector<8xf32> to vector<8x1xf32>
    %77 = vector.broadcast %76 : vector<8x1xf32> to vector<8x8xf32>
    %78 = arith.subf %74, %77 : vector<8x8xf32>
    %79 = math.exp %78 : vector<8x8xf32>
    %cst_27 = arith.constant dense<0.000000e+00> : vector<8xf32>
    %80 = vector.multi_reduction <add>, %79, %cst_27 [1] : vector<8x8xf32> to vector<8xf32>
    %81 = vector.shape_cast %80 : vector<8xf32> to vector<8x1xf32>
    %82 = tpu.reciprocal %81 {approx = true} : vector<8x1xf32> -> vector<8x1xf32>
    %83 = arith.mulf %81, %82 : vector<8x1xf32>
    %cst_28 = arith.constant 2.000000e+00 : f32
    %84 = vector.broadcast %cst_28 : f32 to vector<8x1xf32>
    %85 = arith.subf %84, %83 : vector<8x1xf32>
    %86 = arith.mulf %82, %85 : vector<8x1xf32>
    %87 = vector.broadcast %86 : vector<8x1xf32> to vector<8x8xf32>
    %88 = arith.mulf %79, %87 : vector<8x8xf32>
    %cst_29 = arith.constant dense<0.000000e+00> : vector<8x8xf32>
    %89 = tpu.matmul %73, %88, %cst_29 {dimension_numbers = #tpu.dot_dimension_numbers<[1], [1], [0], [0], [0, 0, 1, 0], [], []>} : vector<8x8xf32>, vector<8x8xf32>, vector<8x8xf32> -> vector<8x8xf32>
    %c24 = arith.constant 24 : index
    %c0_30 = arith.constant 0 : index
    %90 = vector.load %arg8[%c24, %c0_30] : memref<32x16xf32, #tpu.memory_space<vmem>>, vector<8x8xf32>
    tpu.vector_store %arg8[%c24, %c0_30], %89 {strides = array<i32>} : memref<32x16xf32, #tpu.memory_space<vmem>>, vector<8x8xf32>,
    %91 = arith.addf %70, %88 : vector<8x8xf32>
    %cst_31 = arith.constant 2.500000e-01 : f32
    %92 = vector.broadcast %cst_31 : f32 to vector<8x8xf32>
    %93 = arith.mulf %91, %92 : vector<8x8xf32>
    %c0_32 = arith.constant 0 : index
    %c0_33 = arith.constant 0 : index
    %94 = vector.load %arg7[%c0_32, %c0_33] : memref<16x8xf32, #tpu.memory_space<vmem>>, vector<8x8xf32>
    tpu.vector_store %arg7[%c0_32, %c0_33], %93 {strides = array<i32>} : memref<16x8xf32, #tpu.memory_space<vmem>>, vector<8x8xf32>,
    %95 = vector.extract_strided_slice %5 {offsets = [0, 8], sizes = [96, 8], strides = [1, 1]} : vector<96x16xf32> to vector<96x8xf32>
    %cst_34 = arith.constant 0.000000e+00 : f32
    %96 = vector.broadcast %cst_34 : f32 to vector<8x8xf32>
    %97 = vector.extract_strided_slice %95 {offsets = [0, 0], sizes = [8, 8], strides = [1, 1]} : vector<96x8xf32> to vector<8x8xf32>
    %98 = vector.extract_strided_slice %95 {offsets = [32, 0], sizes = [8, 8], strides = [1, 1]} : vector<96x8xf32> to vector<8x8xf32>
    %99 = vector.extract_strided_slice %95 {offsets = [64, 0], sizes = [8, 8], strides = [1, 1]} : vector<96x8xf32> to vector<8x8xf32>
    %cst_35 = arith.constant dense<0.000000e+00> : vector<8x8xf32>
    %100 = tpu.matmul %97, %98, %cst_35 {dimension_numbers = #tpu.dot_dimension_numbers<[0], [0], [1], [1], [0, 1, 1, 1], [], []>} : vector<8x8xf32>, vector<8x8xf32>, vector<8x8xf32> -> vector<8x8xf32>
    %cst_36 = arith.constant dense<0xFF800000> : vector<8xf32>
    %101 = vector.multi_reduction <maximumf>, %100, %cst_36 [1] : vector<8x8xf32> to vector<8xf32>
    %102 = vector.shape_cast %101 : vector<8xf32> to vector<8x1xf32>
    %103 = vector.broadcast %102 : vector<8x1xf32> to vector<8x8xf32>
    %104 = arith.subf %100, %103 : vector<8x8xf32>
    %105 = math.exp %104 : vector<8x8xf32>
    %cst_37 = arith.constant dense<0.000000e+00> : vector<8xf32>
    %106 = vector.multi_reduction <add>, %105, %cst_37 [1] : vector<8x8xf32> to vector<8xf32>
    %107 = vector.shape_cast %106 : vector<8xf32> to vector<8x1xf32>
    %108 = tpu.reciprocal %107 {approx = true} : vector<8x1xf32> -> vector<8x1xf32>
    %109 = arith.mulf %107, %108 : vector<8x1xf32>
    %cst_38 = arith.constant 2.000000e+00 : f32
    %110 = vector.broadcast %cst_38 : f32 to vector<8x1xf32>
    %111 = arith.subf %110, %109 : vector<8x1xf32>
    %112 = arith.mulf %108, %111 : vector<8x1xf32>
    %113 = vector.broadcast %112 : vector<8x1xf32> to vector<8x8xf32>
    %114 = arith.mulf %105, %113 : vector<8x8xf32>
    %cst_39 = arith.constant dense<0.000000e+00> : vector<8x8xf32>
    %115 = tpu.matmul %99, %114, %cst_39 {dimension_numbers = #tpu.dot_dimension_numbers<[1], [1], [0], [0], [0, 0, 1, 0], [], []>} : vector<8x8xf32>, vector<8x8xf32>, vector<8x8xf32> -> vector<8x8xf32>
    %c0_40 = arith.constant 0 : index
    %c8_41 = arith.constant 8 : index
    %116 = vector.load %arg8[%c0_40, %c8_41] : memref<32x16xf32, #tpu.memory_space<vmem>>, vector<8x8xf32>
    tpu.vector_store %arg8[%c0_40, %c8_41], %115 {strides = array<i32>} : memref<32x16xf32, #tpu.memory_space<vmem>>, vector<8x8xf32>,
    %117 = arith.addf %96, %114 : vector<8x8xf32>
    %118 = vector.extract_strided_slice %95 {offsets = [8, 0], sizes = [8, 8], strides = [1, 1]} : vector<96x8xf32> to vector<8x8xf32>
    %119 = vector.extract_strided_slice %95 {offsets = [40, 0], sizes = [8, 8], strides = [1, 1]} : vector<96x8xf32> to vector<8x8xf32>
    %120 = vector.extract_strided_slice %95 {offsets = [72, 0], sizes = [8, 8], strides = [1, 1]} : vector<96x8xf32> to vector<8x8xf32>
    %cst_42 = arith.constant dense<0.000000e+00> : vector<8x8xf32>
    %121 = tpu.matmul %118, %119, %cst_42 {dimension_numbers = #tpu.dot_dimension_numbers<[0], [0], [1], [1], [0, 1, 1, 1], [], []>} : vector<8x8xf32>, vector<8x8xf32>, vector<8x8xf32> -> vector<8x8xf32>
    %cst_43 = arith.constant dense<0xFF800000> : vector<8xf32>
    %122 = vector.multi_reduction <maximumf>, %121, %cst_43 [1] : vector<8x8xf32> to vector<8xf32>
    %123 = vector.shape_cast %122 : vector<8xf32> to vector<8x1xf32>
    %124 = vector.broadcast %123 : vector<8x1xf32> to vector<8x8xf32>
    %125 = arith.subf %121, %124 : vector<8x8xf32>
    %126 = math.exp %125 : vector<8x8xf32>
    %cst_44 = arith.constant dense<0.000000e+00> : vector<8xf32>
    %127 = vector.multi_reduction <add>, %126, %cst_44 [1] : vector<8x8xf32> to vector<8xf32>
    %128 = vector.shape_cast %127 : vector<8xf32> to vector<8x1xf32>
    %129 = tpu.reciprocal %128 {approx = true} : vector<8x1xf32> -> vector<8x1xf32>
    %130 = arith.mulf %128, %129 : vector<8x1xf32>
    %cst_45 = arith.constant 2.000000e+00 : f32
    %131 = vector.broadcast %cst_45 : f32 to vector<8x1xf32>
    %132 = arith.subf %131, %130 : vector<8x1xf32>
    %133 = arith.mulf %129, %132 : vector<8x1xf32>
    %134 = vector.broadcast %133 : vector<8x1xf32> to vector<8x8xf32>
    %135 = arith.mulf %126, %134 : vector<8x8xf32>
    %cst_46 = arith.constant dense<0.000000e+00> : vector<8x8xf32>
    %136 = tpu.matmul %120, %135, %cst_46 {dimension_numbers = #tpu.dot_dimension_numbers<[1], [1], [0], [0], [0, 0, 1, 0], [], []>} : vector<8x8xf32>, vector<8x8xf32>, vector<8x8xf32> -> vector<8x8xf32>
    %c8_47 = arith.constant 8 : index
    %c8_48 = arith.constant 8 : index
    %137 = vector.load %arg8[%c8_47, %c8_48] : memref<32x16xf32, #tpu.memory_space<vmem>>, vector<8x8xf32>
    tpu.vector_store %arg8[%c8_47, %c8_48], %136 {strides = array<i32>} : memref<32x16xf32, #tpu.memory_space<vmem>>, vector<8x8xf32>,
    %138 = arith.addf %117, %135 : vector<8x8xf32>
    %139 = vector.extract_strided_slice %95 {offsets = [16, 0], sizes = [8, 8], strides = [1, 1]} : vector<96x8xf32> to vector<8x8xf32>
    %140 = vector.extract_strided_slice %95 {offsets = [48, 0], sizes = [8, 8], strides = [1, 1]} : vector<96x8xf32> to vector<8x8xf32>
    %141 = vector.extract_strided_slice %95 {offsets = [80, 0], sizes = [8, 8], strides = [1, 1]} : vector<96x8xf32> to vector<8x8xf32>
    %cst_49 = arith.constant dense<0.000000e+00> : vector<8x8xf32>
    %142 = tpu.matmul %139, %140, %cst_49 {dimension_numbers = #tpu.dot_dimension_numbers<[0], [0], [1], [1], [0, 1, 1, 1], [], []>} : vector<8x8xf32>, vector<8x8xf32>, vector<8x8xf32> -> vector<8x8xf32>
    %cst_50 = arith.constant dense<0xFF800000> : vector<8xf32>
    %143 = vector.multi_reduction <maximumf>, %142, %cst_50 [1] : vector<8x8xf32> to vector<8xf32>
    %144 = vector.shape_cast %143 : vector<8xf32> to vector<8x1xf32>
    %145 = vector.broadcast %144 : vector<8x1xf32> to vector<8x8xf32>
    %146 = arith.subf %142, %145 : vector<8x8xf32>
    %147 = math.exp %146 : vector<8x8xf32>
    %cst_51 = arith.constant dense<0.000000e+00> : vector<8xf32>
    %148 = vector.multi_reduction <add>, %147, %cst_51 [1] : vector<8x8xf32> to vector<8xf32>
    %149 = vector.shape_cast %148 : vector<8xf32> to vector<8x1xf32>
    %150 = tpu.reciprocal %149 {approx = true} : vector<8x1xf32> -> vector<8x1xf32>
    %151 = arith.mulf %149, %150 : vector<8x1xf32>
    %cst_52 = arith.constant 2.000000e+00 : f32
    %152 = vector.broadcast %cst_52 : f32 to vector<8x1xf32>
    %153 = arith.subf %152, %151 : vector<8x1xf32>
    %154 = arith.mulf %150, %153 : vector<8x1xf32>
    %155 = vector.broadcast %154 : vector<8x1xf32> to vector<8x8xf32>
    %156 = arith.mulf %147, %155 : vector<8x8xf32>
    %cst_53 = arith.constant dense<0.000000e+00> : vector<8x8xf32>
    %157 = tpu.matmul %141, %156, %cst_53 {dimension_numbers = #tpu.dot_dimension_numbers<[1], [1], [0], [0], [0, 0, 1, 0], [], []>} : vector<8x8xf32>, vector<8x8xf32>, vector<8x8xf32> -> vector<8x8xf32>
    %c16_54 = arith.constant 16 : index
    %c8_55 = arith.constant 8 : index
    %158 = vector.load %arg8[%c16_54, %c8_55] : memref<32x16xf32, #tpu.memory_space<vmem>>, vector<8x8xf32>
    tpu.vector_store %arg8[%c16_54, %c8_55], %157 {strides = array<i32>} : memref<32x16xf32, #tpu.memory_space<vmem>>, vector<8x8xf32>,
    %159 = arith.addf %138, %156 : vector<8x8xf32>
    %160 = vector.extract_strided_slice %95 {offsets = [24, 0], sizes = [8, 8], strides = [1, 1]} : vector<96x8xf32> to vector<8x8xf32>
    %161 = vector.extract_strided_slice %95 {offsets = [56, 0], sizes = [8, 8], strides = [1, 1]} : vector<96x8xf32> to vector<8x8xf32>
    %162 = vector.extract_strided_slice %95 {offsets = [88, 0], sizes = [8, 8], strides = [1, 1]} : vector<96x8xf32> to vector<8x8xf32>
    %cst_56 = arith.constant dense<0.000000e+00> : vector<8x8xf32>
    %163 = tpu.matmul %160, %161, %cst_56 {dimension_numbers = #tpu.dot_dimension_numbers<[0], [0], [1], [1], [0, 1, 1, 1], [], []>} : vector<8x8xf32>, vector<8x8xf32>, vector<8x8xf32> -> vector<8x8xf32>
    %cst_57 = arith.constant dense<0xFF800000> : vector<8xf32>
    %164 = vector.multi_reduction <maximumf>, %163, %cst_57 [1] : vector<8x8xf32> to vector<8xf32>
    %165 = vector.shape_cast %164 : vector<8xf32> to vector<8x1xf32>
    %166 = vector.broadcast %165 : vector<8x1xf32> to vector<8x8xf32>
    %167 = arith.subf %163, %166 : vector<8x8xf32>
    %168 = math.exp %167 : vector<8x8xf32>
    %cst_58 = arith.constant dense<0.000000e+00> : vector<8xf32>
    %169 = vector.multi_reduction <add>, %168, %cst_58 [1] : vector<8x8xf32> to vector<8xf32>
    %170 = vector.shape_cast %169 : vector<8xf32> to vector<8x1xf32>
    %171 = tpu.reciprocal %170 {approx = true} : vector<8x1xf32> -> vector<8x1xf32>
    %172 = arith.mulf %170, %171 : vector<8x1xf32>
    %cst_59 = arith.constant 2.000000e+00 : f32
    %173 = vector.broadcast %cst_59 : f32 to vector<8x1xf32>
    %174 = arith.subf %173, %172 : vector<8x1xf32>
    %175 = arith.mulf %171, %174 : vector<8x1xf32>
    %176 = vector.broadcast %175 : vector<8x1xf32> to vector<8x8xf32>
    %177 = arith.mulf %168, %176 : vector<8x8xf32>
    %cst_60 = arith.constant dense<0.000000e+00> : vector<8x8xf32>
    %178 = tpu.matmul %162, %177, %cst_60 {dimension_numbers = #tpu.dot_dimension_numbers<[1], [1], [0], [0], [0, 0, 1, 0], [], []>} : vector<8x8xf32>, vector<8x8xf32>, vector<8x8xf32> -> vector<8x8xf32>
    %c24_61 = arith.constant 24 : index
    %c8_62 = arith.constant 8 : index
    %179 = vector.load %arg8[%c24_61, %c8_62] : memref<32x16xf32, #tpu.memory_space<vmem>>, vector<8x8xf32>
    tpu.vector_store %arg8[%c24_61, %c8_62], %178 {strides = array<i32>} : memref<32x16xf32, #tpu.memory_space<vmem>>, vector<8x8xf32>,
    %180 = arith.addf %159, %177 : vector<8x8xf32>
    %cst_63 = arith.constant 2.500000e-01 : f32
    %181 = vector.broadcast %cst_63 : f32 to vector<8x8xf32>
    %182 = arith.mulf %180, %181 : vector<8x8xf32>
    %c8_64 = arith.constant 8 : index
    %c0_65 = arith.constant 0 : index
    %183 = vector.load %arg7[%c8_64, %c0_65] : memref<16x8xf32, #tpu.memory_space<vmem>>, vector<8x8xf32>
    tpu.vector_store %arg7[%c8_64, %c0_65], %182 {strides = array<i32>} : memref<16x8xf32, #tpu.memory_space<vmem>>, vector<8x8xf32>,
    %c0_66 = arith.constant 0 : index
    %c0_67 = arith.constant 0 : index
    %184 = vector.load %arg8[%c0_66, %c0_67] : memref<32x16xf32, #tpu.memory_space<vmem>>, vector<32x16xf32>
    %c0_68 = arith.constant 0 : index
    %c0_69 = arith.constant 0 : index
    %185 = vector.load %arg4[%c0_68, %c0_69] : memref<32x32xf32, #tpu.memory_space<vmem>>, vector<32x32xf32>
    %cst_70 = arith.constant dense<0.000000e+00> : vector<16x32xf32>
    %186 = tpu.matmul %184, %185, %cst_70 {dimension_numbers = #tpu.dot_dimension_numbers<[0], [0], [1], [1], [0, 1, 1, 1], [], []>} : vector<32x16xf32>, vector<32x32xf32>, vector<16x32xf32> -> vector<16x32xf32>
    %c0_71 = arith.constant 0 : index
    %c0_72 = arith.constant 0 : index
    %187 = vector.load %arg5[%c0_71, %c0_72] : memref<1x32xf32, #tpu.memory_space<vmem>>, vector<1x32xf32>
    %188 = vector.broadcast %187 : vector<1x32xf32> to vector<16x32xf32>
    %189 = arith.addf %186, %188 : vector<16x32xf32>
    %c0_73 = arith.constant 0 : index
    %c0_74 = arith.constant 0 : index
    %190 = vector.load %arg6[%c0_73, %c0_74] : memref<16x32xf32, #tpu.memory_space<vmem>>, vector<16x32xf32>
    tpu.vector_store %arg6[%c0_73, %c0_74], %189 {strides = array<i32>} : memref<16x32xf32, #tpu.memory_space<vmem>>, vector<16x32xf32>,
    return
  }
  func.func @transform_0(%arg0: i32) -> (i32, i32) {
    %c0_i32 = arith.constant 0 : i32
    %c0_i32_0 = arith.constant 0 : i32
    return %arg0, %c0_i32 : i32, i32
  }
  func.func @transform_1(%arg0: i32) -> (i32, i32) {
    %c0_i32 = arith.constant 0 : i32
    %c0_i32_0 = arith.constant 0 : i32
    %c0_i32_1 = arith.constant 0 : i32
    return %c0_i32, %c0_i32_0 : i32, i32
  }
  func.func @transform_2(%arg0: i32) -> (i32, i32) {
    %c0_i32 = arith.constant 0 : i32
    %c0_i32_0 = arith.constant 0 : i32
    %c0_i32_1 = arith.constant 0 : i32
    return %c0_i32, %c0_i32_0 : i32, i32
  }
  func.func @transform_3(%arg0: i32) -> (i32, i32) {
    %c0_i32 = arith.constant 0 : i32
    %c0_i32_0 = arith.constant 0 : i32
    %c0_i32_1 = arith.constant 0 : i32
    return %c0_i32, %c0_i32_0 : i32, i32
  }
  func.func @transform_4(%arg0: i32) -> (i32, i32) {
    %c0_i32 = arith.constant 0 : i32
    %c0_i32_0 = arith.constant 0 : i32
    %c0_i32_1 = arith.constant 0 : i32
    return %c0_i32, %c0_i32_0 : i32, i32
  }
  func.func @transform_5(%arg0: i32) -> (i32, i32) {
    %c0_i32 = arith.constant 0 : i32
    %c0_i32_0 = arith.constant 0 : i32
    return %arg0, %c0_i32 : i32, i32
  }
  func.func @transform_6(%arg0: i32) -> (i32, i32) {
    %c0_i32 = arith.constant 0 : i32
    %c0_i32_0 = arith.constant 0 : i32
    return %arg0, %c0_i32 : i32, i32
  }
}

</mosaic_0001>

<bundles_post_ra>
// kernel: tpu_custom_call.1
= control target key start
LH: loop header
LB: loop body
LE: loop exit
PB: predicated region body
PF: predicated region fallthrough
CT: control target
= control target key end

     0   :  { %vm109_vm0 = vcmask 261120   ;;  %v1248_v1 = vmov 0   ;;  %s1535_s0 = inlined_call_operand.vmem [shape: f32[16,32], index: 0, kind: input, shape index: {}]   ;;  %s1536_s1 = inlined_call_operand.vmem [shape: f32[96,32], index: 1, kind: input, shape index: {}]   ;;  %s1537_s2 = inlined_call_operand.vmem [shape: f32[96,1], index: 2, kind: input, shape index: {}]   ;;  %s1538_s3 = inlined_call_operand.vmem [shape: f32[32,32], index: 3, kind: input, shape index: {}]   ;;  %s1539_s4 = inlined_call_operand.vmem [shape: f32[1,32], index: 4, kind: input, shape index: {}]   ;;  %s1540_s5 = inlined_call_operand.hbm [shape: f32[16,32], index: 5, kind: output, shape index: {0}]   ;;  %s1541_s6 = inlined_call_operand.vmem [shape: f32[16,8], index: 6, kind: output, shape index: {1}]  }
   0x1   :  { %v36_v0 = vld [vmem:[%s1535_s0 + $0x8] sm:$0xff]  ;;  %1186 = vset.pattern.permute.xlu0 %v1248_v1  ;;  %v35_v3 = vld [vmem:[%s1535_s0] sm:$0xff]  ;;  %1187 = vset.pattern.permute.xlu2 %v1248_v1 }
   0x2   :  { %1136 = vmatpush.xpose.msk.msra.mxu0 %vm109_vm0, %v36_v0  ;;  %v38_v2 = vld [vmem:[%s1537_s2 + $0x8] sm:$0xff]  ;;  %1176 = vmatpush.xpose.msk.msra.mxu1 %vm109_vm0, %v36_v0 }
   0x3   :  { %56 = vperm.xlu0 %1186, %v38_v2   ;;  %1177 = vmatpush.xpose.msk.msra.mxu2 %vm109_vm0, %v36_v0 }
   0x4   :  { %12 = vsyncpa [#allocation4], 0  ;;  %v23_v4 = vld [vmem:[%s1536_s1] sm:$0xff]  ;;  %v42_v5 = vld [vmem:[%s1537_s2 + $0x28] sm:$0xff]  ;;  %vm237_vm1 = vcmask 64512   ;;  %s1249_s15 = smov 120  }
   0x5   :  { %v37_v6 = vld [vmem:[%s1537_s2] sm:$0xff]  ;;  %v24_v7 = vld [vmem:[%s1536_s1 + $0x8] sm:$0xff]  ;;  %v39_v8 = vld [vmem:[%s1537_s2 + $0x10] sm:$0xff]  ;;  %s1250_s24 = smov 8   ;;  %vm704_vm2 = vcmask 130112   ;;  %s1120_s14 = sshll.u32 %s1540_s5, 4  ;;  %s1121_s14 = int_to_ptr.hbm [resolvable:$true] %s1120_s14 }
   0x6   :  { %1137 = vmatpush.xpose.msk.msra.mxu0 %vm109_vm0, %v35_v3  ;;  %1178 = vmatpush.xpose.msk.msra.mxu1 %vm109_vm0, %v35_v3  ;;  %v25_v9 = vld [vmem:[%s1536_s1 + $0x10] sm:$0xff]  ;;  %v41_v10 = vld [vmem:[%s1537_s2 + $0x20] sm:$0xff]  ;;  %v26_v11 = vld [vmem:[%s1536_s1 + $0x18] sm:$0xff] }
   0x7   :  { %1179 = vmatpush.xpose.msk.msra.mxu2 %vm109_vm0, %v35_v3  ;;  %51 = vperm.xlu2 %1187, %v37_v6   ;;  %v40_v12 = vld [vmem:[%s1537_s2 + $0x18] sm:$0xff]  ;;  %v27_v13 = vld [vmem:[%s1536_s1 + $0x20] sm:$0xff]  ;;  %v43_v14 = vld [vmem:[%s1537_s2 + $0x30] sm:$0xff] }
   0x8   :  { %v28_v15 = vld [vmem:[%s1536_s1 + $0x28] sm:$0xff]  ;;  %v44_v17 = vld [vmem:[%s1537_s2 + $0x38] sm:$0xff]  ;;  %v29_v36 = vld [vmem:[%s1536_s1 + $0x30] sm:$0xff] }
   0x9   :  { %1138 = vmatmul.msk.f32.vlgmr.msra.gmra.mxu0 %vm109_vm0, %v23_v4  ;;  %v46_v16 = vld [vmem:[%s1537_s2 + $0x48] sm:$0xff]  ;;  %v30_v38 = vld [vmem:[%s1536_s1 + $0x38] sm:$0xff]  ;;  %v31_v47 = vld [vmem:[%s1536_s1 + $0x40] sm:$0xff] }
   0xa   :  { %v32_v37 = vld [vmem:[%s1536_s1 + $0x48] sm:$0xff]  ;;  %1146 = vmatmul.msk.f32.vlgmr.msra.gmra.mxu1 %vm109_vm0, %v31_v47 }
   0xb   :  { %76 = vperm.xlu0 %1186, %v42_v5   ;;  %1147 = vmatmul.msk.f32.vlgmr.msra.gmra.mxu2 %vm109_vm0, %v32_v37 }
   0xf   :  { %61 = vperm.xlu2 %1187, %v39_v8  }
  0x11   :  { %1139 = vmatmul.msk.f32.gmra.mxu0 %vm109_vm0, %v24_v7 }
  0x17   :  { %71 = vperm.xlu2 %1187, %v41_v10   ;;  %v45_v10 = vld [vmem:[%s1537_s2 + $0x40] sm:$0xff] }
  0x19   :  { %1140 = vmatmul.msk.f32.gmra.mxu0 %vm109_vm0, %v25_v9 }
  0x1f   :  { %66 = vperm.xlu2 %1187, %v40_v12   ;;  %v33_v12 = vld [vmem:[%s1536_s1 + $0x50] sm:$0xff] }
  0x20   :  { %1148 = vmatmul.msk.f32.gmra.mxu2 %vm109_vm0, %v33_v12 }
  0x21   :  { %1141 = vmatmul.msk.f32.gmra.mxu0 %vm109_vm0, %v26_v11 }
  0x27   :  { %81 = vperm.xlu2 %1187, %v43_v14   ;;  %v47_v14 = vld [vmem:[%s1537_s2 + $0x50] sm:$0xff] }
  0x29   :  { %1142 = vmatmul.msk.f32.gmra.mxu0 %vm109_vm0, %v27_v13  ;;  %v34_v13 = vld [vmem:[%s1536_s1 + $0x58] sm:$0xff] }
  0x2a   :  { %1149 = vmatmul.msk.f32.gmra.mxu2 %vm109_vm0, %v34_v13 }
  0x2f   :  { %96 = vperm.xlu2 %1187, %v46_v16  }
  0x31   :  { %1143 = vmatmul.msk.f32.gmra.mxu0 %vm109_vm0, %v28_v15  ;;  %v48_v15 = vld [vmem:[%s1537_s2 + $0x58] sm:$0xff] }
  0x37   :  { %86 = vperm.xlu2 %1187, %v44_v17  }
  0x39   :  { %1144 = vmatmul.msk.f32.gmra.mxu0 %vm109_vm0, %v29_v36 }
  0x41   :  { %1145 = vmatmul.msk.f32.gmra.mxu0 %vm109_vm0, %v30_v38 }
  0x61   :  { %v52_v18 = vpop.permute.xlu2 %51 }
  0x69   :  { %v62_v24 = vpop.permute.xlu2 %61 }
  0x71   :  { %v72_v27 = vpop.permute.xlu2 %71 }
  0x75   :  { %v57_v21 = vpop.permute.xlu0 %56 }
  0x79   :  { %v67_v29 = vpop.permute.xlu2 %66 }
  0x7d   :  { %v77_v33 = vpop.permute.xlu0 %76 }
  0x81   :  { %v82_v40 = vpop.permute.xlu2 %81 }
  0x86   :  { %v169_v19 = vpop.f32.mrf.mxu0 }
  0x87   :  { %v1351_v20 = vadd.f32 %v169_v19, %v52_v18  ;;  %v193_v0 = vpop.f32.mrf.mxu1 }
  0x89   :  { %205 = vxpose.xlu2.b32.start.end [1/1] (short) (narrow) %v1351_v20, 8  ;;  %v97_v45 = vpop.permute.xlu2 %96 }
  0x8e   :  { %v172_v22 = vpop.f32.mrf.mxu0  ;;  %v196_v60 = vpop.f32.mrf.mxu2 }
  0x8f   :  { %v1354_v23 = vadd.f32 %v172_v22, %v57_v21  ;;  %v1398_v63 = vadd.f32 %v196_v60, %v97_v45 }
  0x91   :  { %303 = vxpose.xlu1.b32.start.end [1/1] (short) (narrow) %v1354_v23, 8  ;;  %v87_v46 = vpop.permute.xlu2 %86 }
  0x96   :  { %v175_v25 = vpop.f32.mrf.mxu0 }
  0x97   :  { %v1357_v26 = vadd.f32 %v175_v25, %v62_v24 }
  0x9e   :  { %v178_v28 = vpop.f32.mrf.mxu0 }
  0x9f   :  { %v1359_v30 = vadd.f32 %v178_v28, %v67_v29 }
  0xa1   :  { %497 = vxpose.xlu2.b32.start.end [1/1] (short) (narrow) %v1359_v30, 8 }
  0xa3   :  { %v199_v38 = vpop.f32.mrf.mxu2 }
  0xa6   :  { %v181_v31 = vpop.f32.mrf.mxu0 }
  0xa7   :  { %v1362_v32 = vadd.f32 %v181_v31, %v72_v27 }
  0xa9   :  { %256 = vmatpush.msrb.mxu1 %v1362_v32 }
  0xae   :  { %v184_v34 = vpop.f32.mrf.mxu0 }
  0xaf   :  { %v1365_v35 = vadd.f32 %v184_v34, %v77_v33 }
  0xb1   :  { %353 = vmatpush.msra.mxu3 %v1365_v35 }
  0xb6   :  { %v187_v41 = vpop.f32.mrf.mxu0 }
  0xb7   :  { %v1381_v42 = vadd.f32 %v187_v41, %v82_v40 }
  0xb9   :  { %450 = vmatpush.msrb.mxu3 %v1381_v42 }
  0xbe   :  { %v190_v58 = vpop.f32.mrf.mxu0 }
  0xbf   :  { %v1394_v62 = vadd.f32 %v190_v58, %v87_v46 }
  0xe4   :  { %1188 = vset.pattern.permute.xlu1 %v1248_v1 }
 0x122   :  { %v221_v48 = vpop.trf.xlu2 }
 0x123   :  { %1150 = vmatmul.msk.f32.vlgmr.msrb.gmra.mxu1 %vm237_vm1, %v221_v48 }
 0x135   :  { %v319_v39 = vpop.trf.xlu1 }
 0x136   :  { %1153 = vmatmul.msk.f32.vlgmr.msra.gmra.mxu3 %vm237_vm1, %v319_v39  ;;  %v202_v39 = vpop.f32.mrf.mxu2 }
 0x13a   :  { %v513_v11 = vpop.trf.xlu2 }
 0x1a0   :  { %v258_v1 = vpop.f32.mrf.mxu1 }
 0x1a1   :  { %v261_v2 = vsel %vm237_vm1, %v258_v1, -inf }
 0x1b9   :  { %v355_v43 = vpop.f32.mrf.mxu3 }
 0x1ba   :  { %v358_v44 = vsel %vm237_vm1, %v355_v43, -inf }
 0x1bb   :  { %359 = vmax.xlane.f32.xlu1 %v358_v44 }
 0x22e   :  { %v360_v49 = vpop.xlane.xlu1 %359 }
 0x22f   :  { %v361_v50 = vsub.f32 %v355_v43, %v360_v49 }
 0x231   :  { %v362_v51 = vmul.f32 1.442695, %v361_v50 }
 0x233   :  { %1190 = vpow2.f32 %v362_v51 }
 0x239   :  { %v1191_v52 = vpop.eup %1190 }
 0x23a   :  { %v364_v53 = vsel %vm237_vm1, %v1191_v52, 0.0 }
 0x23b   :  { %365 = vadd.xlane.f32.xlu0 %v364_v53 }
 0x264   :  { %400 = vxpose.xlu0.b32.start.end [1/1] (short) (narrow) %v1357_v26, 8 }
 0x2ae   :  { %v366_v54 = vpop.xlane.xlu0 %365 }
 0x2af   :  { %1192 = vrcp.f32 %v366_v54 }
 0x2b5   :  { %v1193_v55 = vpop.eup %1192 }
 0x2b6   :  { %v368_v56 = vmul.f32 %v1193_v55, %v366_v54 }
 0x2b8   :  { %v369_v57 = vsub.f32 2.0, %v368_v56 }
 0x2ba   :  { %v370_v59 = vmul.f32 %v1193_v55, %v369_v57 }
 0x2bc   :  { %v1392_v61 = vmul.f32 %v1191_v52, %v370_v59 }
 0x2be   :  { %1154 = vmatpush.xpose.msk.msra.mxu1 %vm237_vm1, %v1392_v61 }
 0x2c1   :  { %1155 = vmatmul.msk.f32.vlgmr.msra.gmra.mxu1 %vm237_vm1, %v1398_v63 }
 0x2c2   :  { %547 = vmatpush.msrb.mxu1 %v1394_v62 }
 0x2c9   :  { %1159 = vmatmul.msk.f32.vlgmr.msrb.gmra.mxu1 %vm237_vm1, %v513_v11 }
 0x2d5   :  { %262 = vmax.xlane.f32.xlu0 %v261_v2 }
 0x308   :  { %v416_v3 = vpop.trf.xlu0 }
 0x309   :  { %1156 = vmatmul.msk.f32.vlgmr.msrb.gmra.mxu3 %vm237_vm1, %v416_v3 }
 0x33e   :  { %v395_v4 = vpop.f32.mrf.mxu1 }
 0x33f   :  { %398 = vst.msk [vmem:[#allocation2 + $0x8] sm:$0xff] %vm237_vm1, %v395_v4 }
 0x346   :  { %v549_v36 = vpop.f32.mrf.mxu1 }
 0x347   :  { %v552_v37 = vsel %vm237_vm1, %v549_v36, -inf }
 0x348   :  { %v263_v5 = vpop.xlane.xlu0 %262 }
 0x349   :  { %v264_v6 = vsub.f32 %v258_v1, %v263_v5 }
 0x34b   :  { %v265_v7 = vmul.f32 1.442695, %v264_v6 }
 0x34d   :  { %1194 = vpow2.f32 %v265_v7 }
 0x353   :  { %v1195_v8 = vpop.eup %1194 }
 0x354   :  { %v267_v9 = vsel %vm237_vm1, %v1195_v8, 0.0 }
 0x355   :  { %268 = vadd.xlane.f32.xlu1 %v267_v9 }
 0x36e   :  { %91 = vperm.xlu1 %1188, %v45_v10  }
 0x376   :  { %597 = vrot.lane.b32.xlu1 %v1351_v20, %s1249_s15 }
 0x37e   :  { %708 = vrot.lane.b32.xlu1 %v1354_v23, %s1249_s15 }
 0x386   :  { %101 = vperm.xlu1 %1188, %v47_v14  }
 0x38c   :  { %v452_v16 = vpop.f32.mrf.mxu3 }
 0x38d   :  { %v455_v17 = vsel %vm237_vm1, %v452_v16, -inf }
 0x38e   :  { %456 = vmax.xlane.f32.xlu2 %v455_v17  ;;  %106 = vperm.xlu1 %1188, %v48_v15  }
 0x396   :  { %633 = vrot.lane.b32.xlu1 %v1362_v32, %s1249_s15 }
 0x3c8   :  { %v269_v18 = vpop.xlane.xlu1 %268 }
 0x3c9   :  { %1196 = vrcp.f32 %v269_v18 }
 0x3cf   :  { %v1197_v19 = vpop.eup %1196 }
 0x3d0   :  { %v271_v20 = vmul.f32 %v1197_v19, %v269_v18 }
 0x3d2   :  { %v272_v21 = vsub.f32 2.0, %v271_v20 }
 0x3d4   :  { %v273_v22 = vmul.f32 %v1197_v19, %v272_v21 }
 0x3d6   :  { %v274_v23 = vmul.f32 %v1195_v8, %v273_v22 }
 0x3d8   :  { %1151 = vmatpush.xpose.msk.msrb.mxu2 %vm237_vm1, %v274_v23  ;;  %v399_v52 = vadd.f32 %v1392_v61, %v274_v23 }
 0x3e0   :  { %v92_v24 = vpop.permute.xlu1 %91 }
 0x3e1   :  { %v1433_v25 = vadd.f32 %v193_v0, %v92_v24 }
 0x3e3   :  { %1152 = vmatmul.msk.f32.vlgmr.msrb.gmra.mxu2 %vm237_vm1, %v1433_v25 }
 0x3e8   :  { %v598_v27 = vpop.permute.xlu1 %597 }
 0x3f0   :  { %v709_v28 = vpop.permute.xlu1 %708 }
 0x3f1   :  { %711 = vxpose.xlu0.b32.start.end [1/1] (short) (narrow) %v709_v28, 8 }
 0x3f8   :  { %v102_v40 = vpop.permute.xlu1 %101 }
 0x3f9   :  { %v1446_v54 = vadd.f32 %v199_v38, %v102_v40 }
 0x400   :  { %v107_v43 = vpop.permute.xlu1 %106 }
 0x401   :  { %v457_v29 = vpop.xlane.xlu2 %456  ;;  %v1453_v4 = vadd.f32 %v202_v39, %v107_v43 }
 0x402   :  { %v458_v31 = vsub.f32 %v452_v16, %v457_v29 }
 0x404   :  { %v459_v32 = vmul.f32 1.442695, %v458_v31 }
 0x406   :  { %1198 = vpow2.f32 %v459_v32 }
 0x408   :  { %v634_v44 = vpop.permute.xlu1 %633 }
 0x40c   :  { %v1199_v33 = vpop.eup %1198 }
 0x40d   :  { %v461_v34 = vsel %vm237_vm1, %v1199_v33, 0.0 }
 0x40e   :  { %462 = vadd.xlane.f32.xlu1 %v461_v34 }
 0x416   :  { %553 = vmax.xlane.f32.xlu1 %v552_v37 }
 0x42f   :  { %744 = vrot.lane.b32.xlu1 %v1365_v35, %s1249_s15 }
 0x45f   :  { %928 = vrot.lane.b32.xlu0 %v1359_v30, %s1249_s15 }
 0x466   :  { %v298_v41 = vpop.f32.mrf.mxu2 }
 0x467   :  { %301 = vst.msk [vmem:[#allocation2] sm:$0xff] %vm237_vm1, %v298_v41 }
 0x481   :  { %v463_v45 = vpop.xlane.xlu1 %462 }
 0x482   :  { %1200 = vrcp.f32 %v463_v45 }
 0x488   :  { %v1201_v46 = vpop.eup %1200 }
 0x489   :  { %v465_v47 = vmul.f32 %v1201_v46, %v463_v45  ;;  %v554_v48 = vpop.xlane.xlu1 %553 }
 0x48a   :  { %v555_v49 = vsub.f32 %v549_v36, %v554_v48 }
 0x48b   :  { %v466_v50 = vsub.f32 2.0, %v465_v47 }
 0x48c   :  { %v556_v51 = vmul.f32 1.442695, %v555_v49 }
 0x48d   :  { %v467_v35 = vmul.f32 %v1201_v46, %v466_v50 }
 0x48e   :  { %1202 = vpow2.f32 %v556_v51 }
 0x48f   :  { %v468_v53 = vmul.f32 %v1199_v33, %v467_v35 }
 0x491   :  { %v496_v30 = vadd.f32 %v468_v53, %v399_v52  ;;  %1157 = vmatpush.xpose.msk.msra.mxu2 %vm237_vm1, %v468_v53 }
 0x494   :  { %v1203_v55 = vpop.eup %1202  ;;  %1158 = vmatmul.msk.f32.vlgmr.msra.gmra.mxu2 %vm237_vm1, %v1446_v54 }
 0x495   :  { %654 = vmatpush.msrb.mxu2 %v634_v44  ;;  %v558_v56 = vsel %vm237_vm1, %v1203_v55, 0.0  ;;  %v727_v6 = vpop.trf.xlu0 }
 0x496   :  { %559 = vadd.xlane.f32.xlu1 %v558_v56 }
 0x4a1   :  { %v745_v57 = vpop.permute.xlu1 %744 }
 0x4d0   :  { %600 = vxpose.xlu1.b32.start.end [1/1] (short) (narrow) %v598_v27, 8 }
 0x4d1   :  { %v929_v32 = vpop.permute.xlu0 %928 }
 0x509   :  { %v560_v58 = vpop.xlane.xlu1 %559 }
 0x50a   :  { %1204 = vrcp.f32 %v560_v58 }
 0x510   :  { %v1205_v59 = vpop.eup %1204 }
 0x511   :  { %v562_v60 = vmul.f32 %v1205_v59, %v560_v58 }
 0x513   :  { %v563_v61 = vsub.f32 2.0, %v562_v60 }
 0x515   :  { %v564_v0 = vmul.f32 %v1205_v59, %v563_v61 }
 0x517   :  { %v565_v1 = vmul.f32 %v1203_v55, %v564_v0  ;;  %v492_v2 = vpop.f32.mrf.mxu2 }
 0x518   :  { %495 = vst.msk [vmem:[#allocation2 + $0x10] sm:$0xff] %vm237_vm1, %v492_v2 }
 0x519   :  { %v593_v3 = vadd.f32 %v565_v1, %v496_v30  ;;  %1160 = vmatpush.xpose.msk.msra.mxu3 %vm237_vm1, %v565_v1 }
 0x51b   :  { %v594_v5 = vmul.f32 0.25, %v593_v3 }
 0x51c   :  { %1161 = vmatmul.msk.f32.vlgmr.msra.gmra.mxu3 %vm237_vm1, %v1453_v4 }
 0x51d   :  { %765 = vmatpush.msrb.mxu3 %v745_v57  ;;  %595 = vst.msk [vmem:[%s1541_s6] sm:$0xff] %vm237_vm1, %v594_v5 }
 0x524   :  { %1165 = vmatmul.msk.f32.vlgmr.msrb.gmra.mxu3 %vm237_vm1, %v727_v6 }
 0x52a   :  { %673 = vrot.lane.b32.xlu1 %v1433_v25, %s1249_s15 }
 0x574   :  { %v616_v7 = vpop.trf.xlu1 }
 0x575   :  { %1162 = vmatmul.msk.f32.vlgmr.msrb.gmra.mxu2 %vm237_vm1, %v616_v7 }
 0x59f   :  { %v589_v8 = vpop.f32.mrf.mxu3 }
 0x5a0   :  { %592 = vst.msk [vmem:[#allocation2 + $0x18] sm:$0xff] %vm237_vm1, %v589_v8 }
 0x5a7   :  { %v767_v16 = vpop.f32.mrf.mxu3 }
 0x5a8   :  { %v770_v17 = vsel %vm237_vm1, %v767_v16, -inf }
 0x5f8   :  { %v656_v9 = vpop.f32.mrf.mxu2 }
 0x5f9   :  { %v659_v10 = vsel %vm237_vm1, %v656_v9, -inf }
 0x5fa   :  { %660 = vmax.xlane.f32.xlu2 %v659_v10 }
 0x612   :  { %818 = vrot.lane.b32.xlu2 %v1357_v26, %s1249_s15 }
 0x61a   :  { %784 = vrot.lane.b32.xlu2 %v1398_v63, %s1249_s15 }
 0x66d   :  { %v661_v11 = vpop.xlane.xlu2 %660 }
 0x66e   :  { %v662_v12 = vsub.f32 %v656_v9, %v661_v11 }
 0x670   :  { %v663_v13 = vmul.f32 1.442695, %v662_v12 }
 0x672   :  { %1206 = vpow2.f32 %v663_v13 }
 0x675   :  { %v819_v18 = vpop.permute.xlu2 %818 }
 0x678   :  { %v1207_v14 = vpop.eup %1206 }
 0x679   :  { %v665_v15 = vsel %vm237_vm1, %v1207_v14, 0.0 }
 0x67a   :  { %666 = vadd.xlane.f32.xlu2 %v665_v15 }
 0x67d   :  { %v785_v26 = vpop.permute.xlu2 %784 }
 0x682   :  { %771 = vmax.xlane.f32.xlu2 %v770_v17 }
 0x69a   :  { %854 = vrot.lane.b32.xlu2 %v1381_v42, %s1249_s15  ;;  %v674_v42 = vpop.permute.xlu1 %673 }
 0x6ed   :  { %v667_v19 = vpop.xlane.xlu2 %666 }
 0x6ee   :  { %1208 = vrcp.f32 %v667_v19 }
 0x6f4   :  { %v1209_v63 = vpop.eup %1208 }
 0x6f5   :  { %v669_v20 = vmul.f32 %v1209_v63, %v667_v19  ;;  %v772_v21 = vpop.xlane.xlu2 %771  ;;  %v1045_v19 = vld [vmem:[%s1538_s3 + $0x10] sm:$0xff] }
 0x6f6   :  { %v773_v22 = vsub.f32 %v767_v16, %v772_v21  ;;  %v1043_v21 = vld [vmem:[%s1538_s3] sm:$0xff] }
 0x6f7   :  { %v670_v23 = vsub.f32 2.0, %v669_v20 }
 0x6f8   :  { %v774_v24 = vmul.f32 1.442695, %v773_v22 }
 0x6f9   :  { %v671_v25 = vmul.f32 %v1209_v63, %v670_v23  ;;  %v1044_v63 = vld [vmem:[%s1538_s3 + $0x8] sm:$0xff] }
 0x6fa   :  { %1210 = vpow2.f32 %v774_v24 }
 0x6fb   :  { %v1475_v27 = vmul.f32 %v1207_v14, %v671_v25 }
 0x6fd   :  { %1163 = vmatpush.xpose.msk.msra.mxu1 %vm237_vm1, %v1475_v27  ;;  %v855_v28 = vpop.permute.xlu2 %854 }
 0x700   :  { %v1211_v29 = vpop.eup %1210  ;;  %1164 = vmatmul.msk.f32.vlgmr.msra.gmra.mxu1 %vm237_vm1, %v674_v42 }
 0x701   :  { %875 = vmatpush.msrb.mxu1 %v855_v28  ;;  %v776_v31 = vsel %vm237_vm1, %v1211_v29, 0.0  ;;  %v1189_v28 = vld [vmem:[%s1539_s4] ss:$0 sm:$0xff] }
 0x702   :  { %777 = vadd.xlane.f32.xlu2 %v776_v31 }
 0x71a   :  { %964 = vrot.lane.b32.xlu2 %v1394_v62, %s1249_s15 }
 0x740   :  { %821 = vxpose.xlu2.b32.start.end [1/1] (short) (narrow) %v819_v18, 8 }
 0x748   :  { %931 = vxpose.xlu2.b32.start.end [1/1] (short) (narrow) %v929_v32, 8 }
 0x775   :  { %v778_v33 = vpop.xlane.xlu2 %777 }
 0x776   :  { %1212 = vrcp.f32 %v778_v33 }
 0x77c   :  { %v1213_v34 = vpop.eup %1212 }
 0x77d   :  { %v780_v36 = vmul.f32 %v1213_v34, %v778_v33  ;;  %v965_v40 = vpop.permute.xlu2 %964  ;;  %v697_v43 = vpop.f32.mrf.mxu1 }
 0x77f   :  { %v781_v37 = vsub.f32 2.0, %v780_v36 }
 0x781   :  { %v782_v38 = vmul.f32 %v1213_v34, %v781_v37 }
 0x783   :  { %v783_v39 = vmul.f32 %v1211_v29, %v782_v38 }
 0x785   :  { %1166 = vmatpush.xpose.msk.msra.mxu2 %vm237_vm1, %v783_v39 }
 0x788   :  { %1167 = vmatmul.msk.f32.vlgmr.msra.gmra.mxu2 %vm237_vm1, %v785_v26  ;;  %v1046_v26 = vld [vmem:[%s1538_s3 + $0x18] sm:$0xff]  ;;  %s1251_s3 = smov [#allocation3]  }
 0x789   :  { %985 = vmatpush.msrb.mxu2 %v965_v40  ;;  %s1118_s11 = sshll.u32 %s1251_s3, 4  ;;  %s1119_s11 = int_to_ptr.vmem [resolvable:$true] %s1118_s11 }
 0x7d9   :  { %v837_v41 = vpop.trf.xlu2 }
 0x7da   :  { %1168 = vmatmul.msk.f32.vlgmr.msrb.gmra.mxu1 %vm237_vm1, %v837_v41 }
 0x7e1   :  { %v947_v62 = vpop.trf.xlu2 }
 0x7e2   :  { %1171 = vmatmul.msk.f32.vlgmr.msrb.gmra.mxu2 %vm237_vm1, %v947_v62 }
 0x80b   :  { %v808_v46 = vpop.f32.mrf.mxu2 }
 0x857   :  { %v877_v44 = vpop.f32.mrf.mxu1 }
 0x858   :  { %v880_v45 = vsel %vm237_vm1, %v877_v44, -inf }
 0x859   :  { %881 = vmax.xlane.f32.xlu2 %v880_v45 }
 0x865   :  { %v987_v47 = vpop.f32.mrf.mxu2 }
 0x866   :  { %v990_v48 = vsel %vm237_vm1, %v987_v47, -inf }
 0x867   :  { %991 = vmax.xlane.f32.xlu1 %v990_v48 }
 0x8cc   :  { %v882_v49 = vpop.xlane.xlu2 %881 }
 0x8cd   :  { %v883_v50 = vsub.f32 %v877_v44, %v882_v49 }
 0x8cf   :  { %v884_v51 = vmul.f32 1.442695, %v883_v50 }
 0x8d1   :  { %1214 = vpow2.f32 %v884_v51 }
 0x8d7   :  { %v1215_v35 = vpop.eup %1214 }
 0x8d8   :  { %v886_v52 = vsel %vm237_vm1, %v1215_v35, 0.0 }
 0x8d9   :  { %887 = vadd.xlane.f32.xlu0 %v886_v52 }
 0x8da   :  { %v992_v53 = vpop.xlane.xlu1 %991 }
 0x8db   :  { %v993_v30 = vsub.f32 %v987_v47, %v992_v53 }
 0x8dd   :  { %v994_v55 = vmul.f32 1.442695, %v993_v30 }
 0x8df   :  { %1216 = vpow2.f32 %v994_v55 }
 0x8e5   :  { %v1217_v56 = vpop.eup %1216 }
 0x8e6   :  { %v996_v57 = vsel %vm237_vm1, %v1217_v56, 0.0 }
 0x8e7   :  { %997 = vadd.xlane.f32.xlu1 %v996_v57 }
 0x8ed   :  { %1004 = vrot.lane.b32.xlu0 %v1453_v4, %s1249_s15 }
 0x8f5   :  { %701 = vrot.lane.b32.xlu0 %v697_v43, %s1250_s24 }
 0x900   :  { %894 = vrot.lane.b32.xlu1 %v1446_v54, %s1249_s15  ;;  %v816_v54 = vadd.f32 %v783_v39, %v1475_v27  ;;  %s1252_s15 = smov 128  }
 0x908   :  { %812 = vrot.lane.b32.xlu1 %v808_v46, %s1250_s24 }
 0x94c   :  { %v888_v58 = vpop.xlane.xlu0 %887 }
 0x94d   :  { %1218 = vrcp.f32 %v888_v58 }
 0x953   :  { %v1219_v59 = vpop.eup %1218 }
 0x954   :  { %v890_v60 = vmul.f32 %v1219_v59, %v888_v58 }
 0x956   :  { %v891_v61 = vsub.f32 2.0, %v890_v60 }
 0x958   :  { %v892_v0 = vmul.f32 %v1219_v59, %v891_v61 }
 0x95a   :  { %v893_v1 = vmul.f32 %v1215_v35, %v892_v0  ;;  %v998_v2 = vpop.xlane.xlu1 %997 }
 0x95b   :  { %1220 = vrcp.f32 %v998_v2 }
 0x95c   :  { %1169 = vmatpush.xpose.msk.msra.mxu3 %vm237_vm1, %v893_v1  ;;  %v926_v9 = vadd.f32 %v893_v1, %v816_v54 }
 0x95f   :  { %v1005_v3 = vpop.permute.xlu0 %1004 }
 0x960   :  { %1101 = vmatpush.msrb.mxu3 %v1046_v26 }
 0x961   :  { %v1221_v4 = vpop.eup %1220 }
 0x962   :  { %v1000_v5 = vmul.f32 %v1221_v4, %v998_v2  ;;  %1102 = vmatpush.msrb.mxu3 %v1045_v19 }
 0x964   :  { %v1001_v6 = vsub.f32 2.0, %v1000_v5  ;;  %1103 = vmatpush.msrb.mxu3 %v1044_v63 }
 0x966   :  { %v1002_v7 = vmul.f32 %v1221_v4, %v1001_v6  ;;  %1104 = vmatpush.msrb.mxu3 %v1043_v21 }
 0x967   :  { %v702_v8 = vpop.permute.xlu0 %701 }
 0x968   :  { %v1003_v10 = vmul.f32 %v1217_v56, %v1002_v7  ;;  %705 = vst.msk [vmem:[#allocation2] sm:$0xff] %vm704_vm2, %v702_v8 }
 0x96a   :  { %v1036_v11 = vadd.f32 %v1003_v10, %v926_v9  ;;  %1172 = vmatpush.xpose.msk.msra.mxu1 %vm237_vm1, %v1003_v10 }
 0x96c   :  { %v1037_v12 = vmul.f32 0.25, %v1036_v11 }
 0x96d   :  { %1173 = vmatmul.msk.f32.vlgmr.msra.gmra.mxu1 %vm237_vm1, %v1005_v3 }
 0x96e   :  { %1038 = vst.msk [vmem:[%s1541_s6 + $0x8] sm:$0xff] %vm237_vm1, %v1037_v12 }
 0x96f   :  { %v1039_v17 = vld [vmem:[#allocation2] sm:$0xff] }
 0x972   :  { %v895_v13 = vpop.permute.xlu1 %894 }
 0x973   :  { %1170 = vmatmul.msk.f32.vlgmr.msra.gmra.mxu3 %vm237_vm1, %v895_v13 }
 0x97a   :  { %v813_v14 = vpop.permute.xlu1 %812 }
 0x97b   :  { %815 = vst.msk [vmem:[#allocation2 + $0x8] sm:$0xff] %vm704_vm2, %v813_v14 }
 0x982   :  { %v1040_v18 = vld [vmem:[#allocation2 + $0x8] sm:$0xff] }
 0x9ea   :  { %v1028_v15 = vpop.f32.mrf.mxu1 }
 0x9eb   :  { %1032 = vrot.lane.b32.xlu1 %v1028_v15, %s1250_s24 }
 0x9f6   :  { %v918_v16 = vpop.f32.mrf.mxu3 }
 0x9f7   :  { %922 = vrot.lane.b32.xlu0 %v918_v16, %s1250_s24 }
 0xa19   :  { %1051 = vxpose.xlu0.b32.start [1/4] (short) (narrow) %v1039_v17, 16 }
 0xa21   :  { %1052 = vxpose.xlu0.b32.cont [2/4] (short) (narrow) %v1040_v18, 16 }
 0xa5d   :  { %v1033_v20 = vpop.permute.xlu1 %1032 }
 0xa5e   :  { %1035 = vst.msk [vmem:[#allocation2 + $0x18] sm:$0xff] %vm704_vm2, %v1033_v20 }
 0xa65   :  { %v1042_v24 = vld [vmem:[#allocation2 + $0x18] sm:$0xff] }
 0xa69   :  { %v923_v22 = vpop.permute.xlu0 %922 }
 0xa6a   :  { %925 = vst.msk [vmem:[#allocation2 + $0x10] sm:$0xff] %vm704_vm2, %v923_v22 }
 0xa71   :  { %v1041_v23 = vld [vmem:[#allocation2 + $0x10] sm:$0xff] }
 0xa72   :  { %1053 = vxpose.xlu0.b32.cont [3/4] (short) (narrow) %v1041_v23, 16 }
 0xa7a   :  { %1054 = vxpose.xlu0.b32.end [4/4] (short) (narrow) %v1042_v24, 16 }
 0xb06   :  { %v1067_v25 = vpop.trf.xlu0 }
 0xb07   :  { %1174 = vmatmul.msk.f32.vlgmr.msrb.gmra.mxu3 %vm109_vm0, %v1067_v25 }
 0xb0e   :  { %v1068_v27 = vpop.trf.xlu0 }
 0xb0f   :  { %1175 = vmatmul.msk.f32.gmra.mxu3 %vm109_vm0, %v1068_v27 }
 0xb8a   :  { %v1106_v42 = vpop.f32.mrf.mxu3 }
 0xb8b   :  { %v1107_v29 = vadd.f32 %v1189_v28, %v1106_v42 }
 0xb8d   :  { %1112 = vst.msk [vmem:[#allocation3] sm:$0xff] %vm109_vm0, %v1107_v29 }
 0xb92   :  { %v1109_v31 = vpop.f32.mrf.mxu3 }
 0xb93   :  { %v1110_v32 = vadd.f32 %v1189_v28, %v1109_v31 }
 0xb95   :  { %1113 = vst.msk [vmem:[#allocation3 + $0x8] sm:$0xff] %vm109_vm0, %v1110_v32 }
 0xb96   :  { %1126 = dma.vmem_to_hbm [thread:$0]  %s1119_s11, 256, %s1121_s14, [#allocation4], %s1252_s15, %s1252_s15, %s1250_s24  }
 0xb97   :  { %1246 = dma.done.wait [#allocation4], 256  }
 0xb98   :  { %1247 = vsyncadd [#allocation4], 4294967040 }
 0xb99   :  { %1135 = vsyncpa [#allocation4], 1 }

</bundles_post_ra>
